<compile_context>
chip_gen: v5e
topology: v5e:2x2
jax: 0.10.0
libtpu: 0.0.40
codegen_flags: <defaults>
</compile_context>

<pallas_src>
import jax
import jax.numpy as jnp
from jax.experimental import pallas as pl
from jax.experimental.pallas import tpu as pltpu


def attention_kernel(x_ref, w_ref, b_ref, sig_ref, lin_ref):
    # x_ref   : (C1, T)  one batch element, one spatial tile (T on lanes)
    # w_ref   : (C2, C1) 1x1 conv weight as a matrix
    # b_ref   : (C2, 1)  bias, broadcast over the lane (spatial) axis
    # sig_ref : (C2, T)  sigmoid output
    # lin_ref : (C2, T)  pre-activation output
    y = jnp.dot(w_ref[...], x_ref[...],
                preferred_element_type=jnp.float32)           # (C2, T) on MXU
    y = y + b_ref[...]                                        # lane broadcast
    lin_ref[...] = y.astype(lin_ref.dtype)
    sig_ref[...] = (1.0 / (1.0 + jnp.exp(-y))).astype(sig_ref.dtype)


def _pick_spatial_tile(hw, c1, c2, vmem_budget_bytes=8 * 1024 * 1024):
    """Largest lane-dense (multiple-of-128) tile dividing H*W that fits VMEM.

    Per grid step Pallas double-buffers the input tile and both output tiles:
    bytes ~= 2 * 4 * (C1 + 2*C2) * T.
    """
    bytes_per_lane = 2 * 4 * (c1 + 2 * c2)
    max_tile = max(128, vmem_budget_bytes // max(1, bytes_per_lane))
    if hw <= max_tile:
        return hw
    t = (max_tile // 128) * 128
    while t >= 128:
        if hw % t == 0:
            return t
        t -= 128
    return hw  # fallback: single tile (H*W not factorable into 128-multiples)


def attention_layer_forward(x_nchw, conv_w, conv_b):
    """x_nchw: (N, C1, H, W); conv_w: (C2, C1, 1, 1) OIHW; conv_b: (C2,).

    Returns (sigmoid(x1), x1), both shaped (N, C2, H, W) — matches the PyTorch
    module's forward.
    """
    N, C1, H, W = x_nchw.shape
    C2 = conv_w.shape[0]
    HW = H * W
    T = _pick_spatial_tile(HW, C1, C2)
    num_t = HW // T

    # NCHW-native: merging (H, W) -> H*W is a contiguous reshape (no data movement).
    x_flat = x_nchw.reshape(N, C1, HW)
    w_mat = conv_w[:, :, 0, 0]          # (C2, C1)
    b_col = conv_b.reshape(C2, 1)       # (C2, 1)

    sig, lin = pl.pallas_call(
        attention_kernel,
        out_shape=(
            jax.ShapeDtypeStruct((N, C2, HW), jnp.float32),
            jax.ShapeDtypeStruct((N, C2, HW), jnp.float32),
        ),
        grid=(N, num_t),
        in_specs=[
            pl.BlockSpec((None, C1, T), lambda n, t: (n, 0, t)),
            pl.BlockSpec((C2, C1), lambda n, t: (0, 0)),
            pl.BlockSpec((C2, 1), lambda n, t: (0, 0)),
        ],
        out_specs=(
            pl.BlockSpec((None, C2, T), lambda n, t: (n, 0, t)),
            pl.BlockSpec((None, C2, T), lambda n, t: (n, 0, t)),
        ),
        compiler_params=pltpu.CompilerParams(
            dimension_semantics=("parallel", "parallel")),
    )(x_flat, w_mat, b_col)

    return sig.reshape(N, C2, H, W), lin.reshape(N, C2, H, W)


def _reference_forward(x_nchw, conv_w, conv_b):
    # plain-JAX reference mirroring the PyTorch module exactly
    lin = jnp.einsum("oi,nihw->nohw", conv_w[:, :, 0, 0], x_nchw)
    lin = lin + conv_b[None, :, None, None]
    return jax.nn.sigmoid(lin), lin


if __name__ == "__main__":
    key = jax.random.PRNGKey(0)
    k_x, k_w, k_b = jax.random.split(key, 3)

    N, C1, H, W = 2, 4, 16, 16
    C2 = 8

    x = jax.random.normal(k_x, (N, C1, H, W), dtype=jnp.float32)
    conv_w = jax.random.normal(k_w, (C2, C1, 1, 1), dtype=jnp.float32) * 0.5
    conv_b = jax.random.normal(k_b, (C2,), dtype=jnp.float32) * 0.1

    sig_out, lin_out = attention_layer_forward(x, conv_w, conv_b)
    sig_out = jax.block_until_ready(sig_out)
    lin_out = jax.block_until_ready(lin_out)

    ref_sig, ref_lin = _reference_forward(x, conv_w, conv_b)

    assert sig_out.shape == (N, C2, H, W), sig_out.shape
    assert lin_out.shape == (N, C2, H, W), lin_out.shape
    assert jnp.allclose(lin_out, ref_lin, rtol=1e-4, atol=1e-5), "linear mismatch"
    assert jnp.allclose(sig_out, ref_sig, rtol=1e-4, atol=1e-5), "sigmoid mismatch"

    print("KERNEL_OK")
</pallas_src>

<mosaic_0001>
module attributes {stable_mosaic.version = 11 : i64} {
  func.func @attention_kernel(%arg0: i32, %arg1: i32, %arg2: memref<1x4x256xf32, #tpu.memory_space<vmem>>, %arg3: memref<8x4xf32, #tpu.memory_space<vmem>>, %arg4: memref<8x1xf32, #tpu.memory_space<vmem>>, %arg5: memref<1x8x256xf32, #tpu.memory_space<vmem>>, %arg6: memref<1x8x256xf32, #tpu.memory_space<vmem>>) attributes {dimension_semantics = [#tpu.dimension_semantics<parallel>, #tpu.dimension_semantics<parallel>], iteration_bounds = array<i64: 2, 1>, scalar_prefetch = 0 : i64, scratch_operands = 0 : i64, tpu.core_type = #tpu.core_type<tc>, window_params = [{transform_indices = @transform_0, window_bounds = array<i64: 1, 4, 256>}, {pipeline_mode = #tpu.pipeline_mode<synchronous>, transform_indices = @transform_1, window_bounds = array<i64: 8, 4>}, {pipeline_mode = #tpu.pipeline_mode<synchronous>, transform_indices = @transform_2, window_bounds = array<i64: 8, 1>}, {transform_indices = @transform_3, window_bounds = array<i64: 1, 8, 256>}, {transform_indices = @transform_4, window_bounds = array<i64: 1, 8, 256>}]} {
    %c0 = arith.constant 0 : index
    %c0_0 = arith.constant 0 : index
    %0 = vector.load %arg3[%c0, %c0_0] : memref<8x4xf32, #tpu.memory_space<vmem>>, vector<8x4xf32>
    %c0_1 = arith.constant 0 : index
    %c0_2 = arith.constant 0 : index
    %c0_3 = arith.constant 0 : index
    %1 = vector.load %arg2[%c0_1, %c0_2, %c0_3] : memref<1x4x256xf32, #tpu.memory_space<vmem>>, vector<1x4x256xf32>
    %2 = vector.shape_cast %1 : vector<1x4x256xf32> to vector<4x256xf32>
    %cst = arith.constant dense<0.000000e+00> : vector<8x256xf32>
    %3 = tpu.matmul %0, %2, %cst {dimension_numbers = #tpu.dot_dimension_numbers<[1], [0], [0], [1], [0, 0, 1, 1], [], []>} : vector<8x4xf32>, vector<4x256xf32>, vector<8x256xf32> -> vector<8x256xf32>
    %c0_4 = arith.constant 0 : index
    %c0_5 = arith.constant 0 : index
    %4 = vector.load %arg4[%c0_4, %c0_5] : memref<8x1xf32, #tpu.memory_space<vmem>>, vector<8x1xf32>
    %5 = vector.broadcast %4 : vector<8x1xf32> to vector<8x256xf32>
    %6 = arith.addf %3, %5 : vector<8x256xf32>
    %c0_6 = arith.constant 0 : index
    %c0_7 = arith.constant 0 : index
    %c0_8 = arith.constant 0 : index
    %7 = vector.load %arg6[%c0_6, %c0_7, %c0_8] : memref<1x8x256xf32, #tpu.memory_space<vmem>>, vector<1x8x256xf32>
    %8 = vector.shape_cast %7 : vector<1x8x256xf32> to vector<8x256xf32>
    %9 = vector.shape_cast %6 : vector<8x256xf32> to vector<1x8x256xf32>
    tpu.vector_store %arg6[%c0_6, %c0_7, %c0_8], %9 {strides = array<i32>} : memref<1x8x256xf32, #tpu.memory_space<vmem>>, vector<1x8x256xf32>,
    %cst_9 = arith.constant 0.000000e+00 : f32
    %10 = vector.broadcast %cst_9 : f32 to vector<8x256xf32>
    %11 = arith.subf %10, %6 : vector<8x256xf32>
    %12 = math.exp %11 : vector<8x256xf32>
    %cst_10 = arith.constant 1.000000e+00 : f32
    %13 = vector.broadcast %cst_10 : f32 to vector<8x256xf32>
    %14 = arith.addf %13, %12 : vector<8x256xf32>
    %cst_11 = arith.constant 1.000000e+00 : f32
    %15 = vector.broadcast %cst_11 : f32 to vector<8x256xf32>
    %16 = arith.divf %15, %14 : vector<8x256xf32>
    %c0_12 = arith.constant 0 : index
    %c0_13 = arith.constant 0 : index
    %c0_14 = arith.constant 0 : index
    %17 = vector.load %arg5[%c0_12, %c0_13, %c0_14] : memref<1x8x256xf32, #tpu.memory_space<vmem>>, vector<1x8x256xf32>
    %18 = vector.shape_cast %17 : vector<1x8x256xf32> to vector<8x256xf32>
    %19 = vector.shape_cast %16 : vector<8x256xf32> to vector<1x8x256xf32>
    tpu.vector_store %arg5[%c0_12, %c0_13, %c0_14], %19 {strides = array<i32>} : memref<1x8x256xf32, #tpu.memory_space<vmem>>, vector<1x8x256xf32>,
    return
  }
  func.func @transform_0(%arg0: i32, %arg1: i32) -> (i32, i32, i32) {
    %c0_i32 = arith.constant 0 : i32
    %c0_i32_0 = arith.constant 0 : i32
    return %arg0, %c0_i32, %arg1 : i32, i32, i32
  }
  func.func @transform_1(%arg0: i32, %arg1: i32) -> (i32, i32) {
    %c0_i32 = arith.constant 0 : i32
    %c0_i32_0 = arith.constant 0 : i32
    %c0_i32_1 = arith.constant 0 : i32
    return %c0_i32, %c0_i32_0 : i32, i32
  }
  func.func @transform_2(%arg0: i32, %arg1: i32) -> (i32, i32) {
    %c0_i32 = arith.constant 0 : i32
    %c0_i32_0 = arith.constant 0 : i32
    %c0_i32_1 = arith.constant 0 : i32
    return %c0_i32, %c0_i32_0 : i32, i32
  }
  func.func @transform_3(%arg0: i32, %arg1: i32) -> (i32, i32, i32) {
    %c0_i32 = arith.constant 0 : i32
    %c0_i32_0 = arith.constant 0 : i32
    return %arg0, %c0_i32, %arg1 : i32, i32, i32
  }
  func.func @transform_4(%arg0: i32, %arg1: i32) -> (i32, i32, i32) {
    %c0_i32 = arith.constant 0 : i32
    %c0_i32_0 = arith.constant 0 : i32
    return %arg0, %c0_i32, %arg1 : i32, i32, i32
  }
}

</mosaic_0001>

<bundles_post_ra>
// kernel: tpu_custom_call.1
= control target key start
LH: loop header
LB: loop body
LE: loop exit
PB: predicated region body
PF: predicated region fallthrough
CT: control target
= control target key end

     0   :  { %10 = vsyncpa [#allocation3], 0  ;;  %s858_s0 = inlined_call_operand.vmem [shape: f32[2,4,256], index: 0, kind: input, shape index: {}]   ;;  %s859_s1 = inlined_call_operand.vmem [shape: f32[8,4], index: 1, kind: input, shape index: {}]   ;;  %s860_s2 = inlined_call_operand.vmem [shape: f32[8,1], index: 2, kind: input, shape index: {}]   ;;  %s861_s3 = inlined_call_operand.hbm [shape: f32[2,8,256], index: 3, kind: output, shape index: {0}]   ;;  %s862_s4 = inlined_call_operand.hbm [shape: f32[2,8,256], index: 4, kind: output, shape index: {1}]  }
   0x1   :  { %12 = vsyncpa [#allocation3 + $0x1], 0 }
   0x2   :  { %13 = vsyncpa [#allocation5], 0 }
   0x3   :  { %15 = vsyncpa [#allocation5 + $0x1], 0  ;;  %s729_s15 = smov 0   ;;  %s731_s16 = smov 0  }
   0x4   :  { %s733_s17 = smov 0   ;;  %s735_s18 = smov 0  }
   0x5   :  { %s737_s19 = smov 0   ;;  %s739_s20 = smov 0  }
   0x6 LB: > { %s497_s21 = sadd.s32 4294967295, %s701_s20   ;;  %s498_s22 = sadd.s32 4294967294, %s701_s20   ;;  %s701_s20 = sphi %s739_s20, %s21_s20   ;;  %s697_s19 = sphi %s737_s19, %s869_s19   ;;  %s693_s18 = sphi %s735_s18, %s868_s18   ;;  %s689_s17 = sphi %s733_s17, %s867_s17   ;;  %s685_s16 = sphi %s731_s16, %s866_s16   ;;  %s681_s15 = sphi %s729_s15, %s865_s15  }
   0x7   : > { %s33_s23 = sadd.s32 1, %s697_s19  ;;  %s112_s24 = sadd.s32 1, %s689_s17 }
   0x8   : > { %p35_p0 = scmp.ge.s32.totalorder %s33_s23, 2  ;;  %p122_p1 = scmp.ne.s32.totalorder %s689_s17, %s685_s16 }
   0x9   : > { %p123_p2 = scmp.eq.s32.totalorder %s497_s21, 1  ;;  %p128_p3 = scmp.ne.s32.totalorder %s685_s16, %s681_s15 }
   0xa   : > { %s871_s23 = smov (%p35_p0, %s33_s23), 0  ;;  %p129_p5 = scmp.eq.s32.totalorder %s498_s22, 1 }
   0xb   : > { %p769_p4 = por %p123_p2, %p122_p1  ;;  %s107_s26 = ssub.s32 %s697_s19, %s871_s23 }
   0xc   : > { %p501_p6 = scmp.ge.s32.totalorder %s701_s20, 1  ;;  %p110_p7 = scmp.eq.s32.totalorder %s107_s26, 0 }
   0xd   : > { %p776_p8 = por %p129_p5, %p128_p3  ;;  %p194_p9 = scmp.lt.s32.totalorder %s701_s20, 3 }
   0xe   : > { %s782_s28 = scalar_select %p110_p7, %s689_s17, %s112_s24  }
   0xf   : > { %p195_p10 = pnand %p501_p6, %p194_p9 }
  0x10   : > { %p230_p11 = scmp.lt.s32.totalorder (!%p195_p10), %s693_s18, 1  ;;  %s796_s12 = sand.u32 (!%p195_p10), 1, %s685_s16  }
  0x11   : > { %198 = sbr.rel (%p195_p10) target bundleno = 198 (0xc6), region = 32  ;;  %s519_s13 = sshll.u32 (!%p195_p10), %s693_s18, 4 }
  0x12   : > { %s502_s14 = sshll.u32 (!%p195_p10), %s796_s12, 4  ;;  %s380_s24 = scalar_lea.hbm (!%p195_p10), %s862_s4, %s519_s13 }
  0x13   : > { %s228_s26 = scalar_lea.vmem (!%p195_p10), [#allocation4], %s502_s14  ;;  %s384_s30 = sshll.u32 (!%p195_p10), %s380_s24, 4  ;;  %s385_s30 = int_to_ptr.hbm [resolvable:$true] %s384_s30 }
  0x14   : > { %s382_s29 = sshll.u32 (!%p195_p10), %s228_s26, 4  ;;  %s611_s10 = scalar_lea.hbm (!%p195_p10), %s862_s4, 32  ;;  %s383_s29 = int_to_ptr.vmem [resolvable:$true] %s382_s29 }
  0x16   : > { %v243_v0 = vld [vmem:[%s860_s2] sm:$0xff]  ;;  %v703_v1 = vmov 0   ;;  %s231_s5 = scalar_select %p230_p11, %s693_s18, 1  ;;  %vm257_vm0 = vcmask 1043456   ;;  %vm253_vm1 = vcmask 31744  }
  0x17   : > { %582 = vset.pattern.permute.xlu0 %v703_v1  ;;  %v241_v3 = vld [vmem:[%s859_s1] sm:$0xff] }
  0x18   : > { %246 = vperm.xlu0 %582, %v243_v0   ;;  %s518_s6 = sshll.u32 %s231_s5, 3  ;;  %s350_s5 = scalar_lea.sflag [#allocation5], %s796_s12 }
  0x19   : > { %s237_s9 = scalar_lea.vmem %s858_s0, %s518_s6  ;;  %s605_s6 = sshra.s32 %s385_s30, 4  ;;  %s606_s6 = int_to_ptr.hbm [resolvable:$true] %s605_s6 }
  0x1a   : > { %v242_v2 = vld [vmem:[%s237_s9] sm:$0xff]  ;;  %s607_s7 = scalar_lea.hbm %s606_s6, 16  ;;  %p612_p1 = scmp.lt.s32.totalorder %s606_s6, %s862_s4 }
  0x1b   : > { %250 = vst [vmem:[#allocation1] ss:$2 sm:$0xff] %v242_v2  ;;  %p608_p12 = scmp.ne.s32.totalorder %s606_s6, %s607_s7  ;;  %p613_p2 = scmp.lt.s32.totalorder %s611_s10, %s607_s7 }
  0x1d   : > { %p609_p13 = pnand %p608_p12, %p769_p4  ;;  %p614_p3 = por %p613_p2, %p612_p1 }
  0x1f   : > { %p610_p0 = pneg %p609_p13 }
  0x21   : > { %p615_p5 = pnand %p614_p3, %p610_p0 }
  0x22   : > { %v251_v4 = vld.sshfl [vmem:[#allocation1] sm:$0xff pattern:$0x75316420]  ;;  %v252_v5 = vld.sshfl [vmem:[#allocation1 + $0x8] sm:$0xff pattern:$0x75316420] }
  0x23   : > { %506 = vmatpush.msk.msra.mxu0 %vm257_vm0, %v251_v4  ;;  %508 = vmatpush.msk.msra.mxu1 %vm257_vm0, %v252_v5 }
  0x24   : > { %507 = vmatmul.msk.f32.vlgmr.msra.gmra.mxu0 %vm253_vm1, %v241_v3  ;;  %509 = vmatmul.msk.f32.vlgmr.msra.gmra.mxu1 %vm253_vm1, %v241_v3 }
  0x8a   : > { %v247_v6 = vpop.permute.xlu0 %246 }
  0xa1   : > { %v279_v7 = vpop.f32.mrf.mxu0  ;;  %v299_v8 = vpop.f32.mrf.mxu1 }
  0xa2   : > { %v280_v9 = vadd.f32 %v279_v7, %v247_v6  ;;  %v300_v10 = vadd.f32 %v299_v8, %v247_v6 }
  0xa4   : > { %302 = vst [vmem:[%s228_s26] sm:$0xff] %v280_v9  ;;  %v304_v11 = vsub.f32 0.0, %v280_v9  ;;  %v305_v12 = vsub.f32 0.0, %v300_v10 }
  0xa5   : > { %303 = vst [vmem:[%s228_s26 + $0x8] sm:$0xff] %v300_v10 }
  0xa6   : > { %v306_v13 = vmul.f32 1.442695, %v304_v11  ;;  %v308_v14 = vmul.f32 1.442695, %v305_v12 }
  0xa7   : > { %618 = shalt.err (!%p615_p5)
}
  0xa8   : > { %522 = dma.vmem_to_hbm [thread:$0]  (%p769_p4), %s383_s29, 256, %s385_s30, %s350_s5   ;;  %583 = vpow2.f32 %v306_v13 }
  0xa9   : > { %585 = vpow2.f32 %v308_v14  ;;  %s363_s26 = scalar_lea.hbm %s861_s3, %s519_s13  ;;  %s221_s29 = scalar_lea.vmem [#allocation2], %s502_s14 }
  0xaa   : > { %s365_s30 = sshll.u32 %s221_s29, 4  ;;  %s367_s5 = sshll.u32 %s363_s26, 4  ;;  %s366_s30 = int_to_ptr.vmem [resolvable:$true] %s365_s30  ;;  %s368_s5 = int_to_ptr.hbm [resolvable:$true] %s367_s5 }
  0xab   : > { %s345_s18 = scalar_lea.sflag [#allocation3], %s796_s12  ;;  %s633_s13 = sshra.s32 %s368_s5, 4  ;;  %s634_s13 = int_to_ptr.hbm [resolvable:$true] %s633_s13 }
  0xac   : > { %s635_s14 = scalar_lea.hbm %s634_s13, 16  ;;  %s639_s8 = scalar_lea.hbm %s861_s3, 32 }
  0xad   : > { %p636_p6 = scmp.ne.s32.totalorder %s634_s13, %s635_s14  ;;  %p640_p10 = scmp.lt.s32.totalorder %s634_s13, %s861_s3 }
  0xae   : > { %v584_v15 = vpop.eup %583  ;;  %p641_p11 = scmp.lt.s32.totalorder %s639_s8, %s635_s14 }
  0xaf   : > { %v586_v16 = vpop.eup %585  ;;  %v310_v17 = vadd.f32 1.0, %v584_v15  ;;  %p637_p7 = pnand %p636_p6, %p769_p4 }
  0xb0   : > { %v311_v18 = vadd.f32 1.0, %v586_v16  ;;  %p642_p12 = por %p641_p11, %p640_p10 }
  0xb1   : > { %587 = vrcp.f32 %v310_v17  ;;  %v323_v24 = vand.u32 2147483648, %v310_v17  ;;  %v321_v27 = vand.u32 2147483647, %v310_v17  ;;  %vm317_vm4 = vweird.f32 %v310_v17  ;;  %p638_p9 = pneg %p637_p7 }
  0xb2   : > { %589 = vrcp.f32 %v311_v18  ;;  %v338_v28 = vand.u32 2147483648, %v311_v18  ;;  %v336_v30 = vand.u32 2147483647, %v311_v18  ;;  %vm332_vm6 = vweird.f32 %v311_v18 }
  0xb3   : > { %v324_v32 = vor.u32 1.1754944e-38, %v323_v24  ;;  %vm322_vm7 = vcmp.eq.f32.partialorder %v321_v27, 8.507059e+37  ;;  %p643_p13 = pnand %p642_p12, %p638_p9 }
  0xb4   : > { %v339_v35 = vor.u32 1.1754944e-38, %v338_v28  ;;  %vm337_vm9 = vcmp.eq.f32.partialorder %v336_v30, 8.507059e+37 }
  0xb7   : > { %v588_v19 = vpop.eup %587 }
  0xb8   : > { %v590_v20 = vpop.eup %589  ;;  %v313_v21 = vmul.f32 %v588_v19, %v310_v17  ;;  %vm318_vm2 = vweird.f32 %v588_v19 }
  0xb9   : > { %v328_v22 = vmul.f32 %v590_v20, %v311_v18  ;;  %vm333_vm3 = vweird.f32 %v590_v20  ;;  %vm319_vm5 = vmor %vm317_vm4, %vm318_vm2 }
  0xba   : > { %v314_v23 = vsub.f32 1.0, %v313_v21  ;;  %vm334_vm8 = vmor %vm332_vm6, %vm333_vm3 }
  0xbb   : > { %v329_v25 = vsub.f32 1.0, %v328_v22 }
  0xbc   : > { %v315_v26 = vmul.f32 %v588_v19, %v314_v23 }
  0xbd   : > { %v330_v29 = vmul.f32 %v590_v20, %v329_v25 }
  0xbe   : > { %v316_v31 = vadd.f32 %v588_v19, %v315_v26 }
  0xbf   : > { %v331_v33 = vadd.f32 %v590_v20, %v330_v29 }
  0xc0   : > { %v320_v34 = vsel %vm319_vm5, %v588_v19, %v316_v31 }
  0xc1   : > { %v325_v36 = vsel %vm322_vm7, %v324_v32, %v320_v34  ;;  %v335_v37 = vsel %vm334_vm8, %v590_v20, %v331_v33 }
  0xc2   : > { %v340_v38 = vsel %vm337_vm9, %v339_v35, %v335_v37  ;;  %342 = vst [vmem:[%s221_s29] sm:$0xff] %v325_v36 }
  0xc3   : > { %343 = vst [vmem:[%s221_s29 + $0x8] sm:$0xff] %v340_v38 }
  0xc4   : > { %646 = shalt.err (!%p643_p13)
}
  0xc5   : > { %521 = dma.vmem_to_hbm [thread:$0]  (%p769_p4), %s366_s30, 256, %s368_s5, %s345_s18  }
  0xc6 PF: > { %p532_p0 = scmp.ge.s32.totalorder %s701_s20, 2  ;;  %s396_s12 = sand.u32 1, %s681_s15  }
  0xc7   : > { %s397_s11 = scalar_lea.sflag [#allocation3], %s396_s12 }
  0xc8   : > { %p526_p1 = pnand %p532_p0, %p776_p8 }
  0xca   : > { %p527_p2 = pneg %p526_p1 }
  0xcc   : > { %672 = dma.done.wait (%p527_p2), %s397_s11, 256  }
  0xcd   : > { %674 = vsyncadd (%p527_p2), %s397_s11, 4294967040  ;;  %s407_s21 = scalar_lea.sflag [#allocation5], %s396_s12 }
  0xce   : > { %676 = dma.done.wait (%p527_p2), %s407_s21, 256  }
  0xcf   : > { %678 = vsyncadd (%p527_p2), %s407_s21, 4294967040  ;;  %s21_s20 = sadd.s32 1, %s701_s20   ;;  %s865_s15 = smov %s685_s16 }
  0xd0   : > { %p18_p3 = scmp.ge.s32.totalorder %s21_s20, 4   ;;  %s866_s16 = smov %s689_s17 }
  0xd1   : > { %s867_s17 = smov %s782_s28  ;;  %s868_s18 = smov %s697_s19 }
  0xd2   : > { %s869_s19 = smov %s871_s23  ;;  %20 = sbr.rel (!%p18_p3) target bundleno = 6 (0x6), region = 84 }
  0xd7   :  { %413 = vsyncpa [#allocation3], 1 }
  0xd8   :  { %415 = vsyncpa [#allocation3 + $0x1], 1 }
  0xd9   :  { %416 = vsyncpa [#allocation5], 1 }
  0xda   :  { %418 = vsyncpa [#allocation5 + $0x1], 1 }

</bundles_post_ra>
